<compile_context>
chip_gen: v6e
topology: v6e:2x2x1
jax: 0.10.0
libtpu: 0.0.40
codegen_flags: <defaults>
</compile_context>

<pallas_src>
import math

import jax
import jax.numpy as jnp
from jax.experimental import pallas as pl
from jax.experimental.pallas import tpu as pltpu


_INV_SQRT2 = 1.0 / math.sqrt(2.0)

# Sublane packing by element byte-width (rows per sublane group).
_SUBLANE_BY_ITEMSIZE = {4: 8, 2: 16, 1: 32}

# ~6 MiB per block: 2x(in block) + 2x(out block) ≈ 24 MiB, well inside the
# explicit 48 MiB scoped-VMEM limit below (and inside v7x's 64 MiB physical).
_TARGET_TILE_BYTES = 6 << 20
_VMEM_LIMIT_BYTES = 48 << 20


def _gelu_kernel(x_ref, o_ref):
    # Exact erf GeLU.  Compute in f32 (required on v5e — no bf16 VPU/EUP) and
    # cast back.  On v5e/v6e this compute is free filler under the HBM DMA.
    # TODO(synk): on v7x check the bundle dump — if VALU/EUP is the critical
    # slot, move part of the chain to bf16 and re-validate vs the erf reference.
    xf = x_ref[...].astype(jnp.float32)
    y = xf * (0.5 + 0.5 * jax.lax.erf(xf * _INV_SQRT2))
    o_ref[...] = y.astype(o_ref.dtype)


def _cdiv(a, b):
    return (a + b - 1) // b


def _round_up(a, b):
    return _cdiv(a, b) * b


def gelu_pallas(x):
    """Exact (erf) GeLU, elementwise, via a Pallas TPU kernel.

    Accepts any shape; presents the data as a lane-dense 2D slab (reshape
    only on the common paths), processes it tiled, restores the shape.
    """
    orig_shape = x.shape
    dtype = x.dtype
    itemsize = jnp.dtype(dtype).itemsize
    sublane = _SUBLANE_BY_ITEMSIZE.get(itemsize, 8)

    n = 1
    for d in orig_shape:
        n *= int(d)
    if n == 0:
        return x

    last = int(orig_shape[-1]) if x.ndim >= 1 else 1

    # ---- pick a lane-dense 2D view, avoiding extra HBM passes -------------
    sliced = False
    if last % 128 == 0 and last * sublane * itemsize <= _TARGET_TILE_BYTES:
        # Fast path: last dim is already lane-dense — reshape only.
        w = last
        x2d = x.reshape(-1, w)
    elif n % 128 == 0:
        # Whole tensor flattens to a lane-dense slab with no padding:
        # largest multiple of 128 (<= 2048) that divides n.
        w = 128
        for cand in range(2048, 127, -128):
            if n % cand == 0:
                w = cand
                break
        x2d = x.reshape(-1, w)
    else:
        # Rare fallback: pad the flat tail to a lane-dense width.
        # Zero-padding is safe (GeLU(0) == 0); the tail is sliced off after.
        w = min(2048, _round_up(n, 128))
        n_pad = _round_up(n, w)
        x2d = jnp.pad(x.reshape(-1), (0, n_pad - n)).reshape(-1, w)
        sliced = True

    rows = x2d.shape[0]

    # ---- row tile: multiple of the sublane packing, ~_TARGET_TILE_BYTES ----
    row_tile = max(
        sublane,
        (_TARGET_TILE_BYTES // (w * itemsize)) // sublane * sublane,
    )
    if rows <= row_tile:
        # Single block covering the full row extent (block dim == array dim
        # is always legal, regardless of sublane divisibility).
        row_tile = rows

    # Partial last block (if rows % row_tile != 0) is masked by Pallas —
    # no row round-up / padding needed.
    grid = (pl.cdiv(rows, row_tile),)

    cost = pl.CostEstimate(
        flops=8 * n,
        transcendentals=n,
        bytes_accessed=2 * n * itemsize,
    )

    out = pl.pallas_call(
        _gelu_kernel,
        out_shape=jax.ShapeDtypeStruct((rows, w), dtype),
        grid_spec=pltpu.PrefetchScalarGridSpec(
            num_scalar_prefetch=0,
            grid=grid,
            in_specs=[pl.BlockSpec((row_tile, w), lambda i: (i, 0))],
            out_specs=pl.BlockSpec((row_tile, w), lambda i: (i, 0)),
        ),
        # TODO(synk): on v7x, profile whether the single "parallel" axis is
        # sharded across both TensorCores; if not, add a leading CORE_PARALLEL
        # grid axis of size 2 and split rows between cores.
        compiler_params=pltpu.CompilerParams(
            dimension_semantics=("parallel",),
            vmem_limit_bytes=_VMEM_LIMIT_BYTES,
        ),
        cost_estimate=cost,
    )(x2d)

    if sliced:
        return out.reshape(-1)[:n].reshape(orig_shape)
    return out.reshape(orig_shape)


def gelu_ref(x):
    xf = x.astype(jnp.float32)
    return (xf * 0.5 * (1.0 + jax.lax.erf(xf * _INV_SQRT2))).astype(x.dtype)


if __name__ == "__main__":
    key = jax.random.PRNGKey(0)
    # Transformer-activation-like shape: [batch, seq, hidden]
    batch, seq, hidden = 2, 8, 32
    x = jax.random.normal(key, (batch, seq, hidden), dtype=jnp.float32)

    y = gelu_pallas(x)
    jax.block_until_ready(y)

    y_ref = gelu_ref(x)
    assert y.shape == x.shape and y.dtype == x.dtype
    assert jnp.allclose(y, y_ref, atol=1e-6, rtol=1e-6), "mismatch vs reference"

    print("KERNEL_OK")
</pallas_src>

<mosaic_0001>
module attributes {stable_mosaic.version = 11 : i64} {
  func.func @_gelu_kernel(%arg0: i32, %arg1: memref<1x512xf32, #tpu.memory_space<vmem>>, %arg2: memref<1x512xf32, #tpu.memory_space<vmem>>) attributes {dimension_semantics = [#tpu.dimension_semantics<parallel>], iteration_bounds = array<i64: 1>, scalar_prefetch = 0 : i64, scratch_operands = 0 : i64, tpu.core_type = #tpu.core_type<tc>, window_params = [{transform_indices = @transform_0, window_bounds = array<i64: 1, 512>}, {transform_indices = @transform_1, window_bounds = array<i64: 1, 512>}]} {
    %c0 = arith.constant 0 : index
    %c0_0 = arith.constant 0 : index
    %0 = vector.load %arg1[%c0, %c0_0] : memref<1x512xf32, #tpu.memory_space<vmem>>, vector<1x512xf32>
    %cst = arith.constant 0.707106769 : f32
    %1 = vector.broadcast %cst : f32 to vector<1x512xf32>
    %2 = arith.mulf %0, %1 : vector<1x512xf32>
    %3 = math.erf %2 : vector<1x512xf32>
    %cst_1 = arith.constant 5.000000e-01 : f32
    %4 = vector.broadcast %cst_1 : f32 to vector<1x512xf32>
    %5 = arith.mulf %4, %3 : vector<1x512xf32>
    %cst_2 = arith.constant 5.000000e-01 : f32
    %6 = vector.broadcast %cst_2 : f32 to vector<1x512xf32>
    %7 = arith.addf %6, %5 : vector<1x512xf32>
    %8 = arith.mulf %0, %7 : vector<1x512xf32>
    %c0_3 = arith.constant 0 : index
    %c0_4 = arith.constant 0 : index
    %9 = vector.load %arg2[%c0_3, %c0_4] : memref<1x512xf32, #tpu.memory_space<vmem>>, vector<1x512xf32>
    tpu.vector_store %arg2[%c0_3, %c0_4], %8 {strides = array<i32>} : memref<1x512xf32, #tpu.memory_space<vmem>>, vector<1x512xf32>,
    return
  }
  func.func @transform_0(%arg0: i32) -> (i32, i32) {
    %c0_i32 = arith.constant 0 : i32
    %c0_i32_0 = arith.constant 0 : i32
    return %arg0, %c0_i32 : i32, i32
  }
  func.func @transform_1(%arg0: i32) -> (i32, i32) {
    %c0_i32 = arith.constant 0 : i32
    %c0_i32_0 = arith.constant 0 : i32
    return %arg0, %c0_i32 : i32, i32
  }
}

</mosaic_0001>

<bundles_post_ra>
// kernel: tpu_custom_call.1
= control target key start
LH: loop header
LB: loop body
LE: loop exit
PB: predicated region body
PF: predicated region fallthrough
CT: control target
= control target key end

     0   :  { %6 = vsyncpa [#allocation3], 0  ;;  %s113_s0 = inlined_call_operand.hbm [shape: f32[1,512], index: 0, kind: input, shape index: {}]   ;;  %s114_s1 = inlined_call_operand.hbm [shape: f32[1,512], index: 1, kind: output, shape index: {}]  }
   0x1   :  { %7 = vsyncpa [#allocation4], 0  ;;  %s95_s6 = smov [#allocation2]  }
   0x2   :  { %s14_s7 = sshll.u32 %s95_s6, 4  ;;  %s15_s7 = int_to_ptr.vmem [resolvable:$true] %s14_s7 }
   0x3   :  { %s59_s8 = scalar_lea.vmem %s15_s7, 64  ;;  %p64_p1 = scmp.lt.s32.totalorder %s15_s7, %s15_s7 }
   0x4   :  { %p60_p0 = scmp.ne.s32.totalorder %s15_s7, %s59_s8  ;;  %p65_p2 = scmp.lt.s32.totalorder %s59_s8, %s59_s8 }
   0x6   :  { %p66_p3 = por %p65_p2, %p64_p1 }
   0x8   :  { %p67_p4 = pnand %p66_p3, %p60_p0 }
   0xa   :  { %70 = shalt.err (!%p67_p4)
}
   0xb   :  { %17 = dma.hbm_to_vmem [thread:$0]  %s113_s0, 64, %s15_s7, [#allocation3]  }
   0xc   :  { %91 = dma.done.wait [#allocation3], 64  }
   0xd   :  { %92 = vsyncadd [#allocation3], 4294967232  ;;  %v21_v0 = vld [vmem:[#allocation2] sm:$0xf]  ;;  %v27_v3 = vlaneseq  ;;  %s96_s11 = smov [#allocation5]  }
   0xe   :  { %v22_v1 = vmul.f32 0.70710677, %v21_v0  ;;  %s38_s12 = sshll.u32 %s96_s11, 4  ;;  %s39_s12 = int_to_ptr.vmem [resolvable:$true] %s38_s12 }
   0xf   :  { %vm29_vm0 = vcmp.lt.s32.totalorder %v27_v3, 512  ;;  %s71_s13 = scalar_lea.vmem %s39_s12, 64  ;;  %p76_p6 = scmp.lt.s32.totalorder %s39_s12, %s39_s12 }
  0x10   :  { %49 = verf.f32 %v22_v1  ;;  %p72_p5 = scmp.ne.s32.totalorder %s39_s12, %s71_s13  ;;  %p77_p7 = scmp.lt.s32.totalorder %s71_s13, %s71_s13 }
  0x12   :  { %p78_p8 = por %p77_p7, %p76_p6 }
  0x14   :  { %p79_p9 = pnand %p78_p8, %p72_p5 }
  0x1d   :  { %v50_v2 = vpop.eup %49 }
  0x1e   :  { %v24_v4 = vmul.f32 0.5, %v50_v2 }
  0x20   :  { %v25_v5 = vadd.f32 0.5, %v24_v4 }
  0x22   :  { %v26_v6 = vmul.f32 %v25_v5, %v21_v0 }
  0x24   :  { %31 = vst.msk [vmem:[#allocation5] sm:$0xf] %vm29_vm0, %v26_v6 }
  0x25   :  { %82 = shalt.err (!%p79_p9)
}
  0x26   :  { %41 = dma.vmem_to_hbm [thread:$0]  %s39_s12, 64, %s114_s1, [#allocation4]  }
  0x27   :  { %93 = dma.done.wait [#allocation4], 64  }
  0x28   :  { %94 = vsyncadd [#allocation4], 4294967232 }
  0x29   :  { %45 = vsyncpa [#allocation3], 1 }
  0x2a   :  { %46 = vsyncpa [#allocation4], 1 }

</bundles_post_ra>
